<compile_context>
chip_gen: v5e
topology: v5e:2x2
jax: 0.10.0
libtpu: 0.0.40
codegen_flags: <defaults>
</compile_context>

<pallas_src>
import math
import functools

import jax
import jax.numpy as jnp
import numpy as np
from jax import lax
from jax.experimental import pallas as pl
from jax.experimental.pallas import tpu as pltpu


def _mha_kernel(num_heads, d_k, batch_block, seq_len,
                q_ref, k_ref, v_ref,
                wq_ref, wk_ref, wv_ref, wo_ref,
                bq_ref, bk_ref, bv_ref, bo_ref,
                o_ref):
    """Grid = (B // Bb,). One step: fused projections over Bb*S rows, per-(batch, head)
    softmax attention, single fused output projection, one lane-dense output write."""
    Bb, S = batch_block, seq_len
    E = num_heads * d_k
    M = Bb * S

    # (Bb, S, E) -> (Bb*S, E): contiguous reshape, last (lane) dim unchanged.
    xq = q_ref[...].reshape(M, E)
    xk = k_ref[...].reshape(M, E)
    xv = v_ref[...].reshape(M, E)

    # Canonical (M,E)@(E,E) matmuls on pre-transposed bf16 weights, f32 accumulation.
    # 1/sqrt(d_k) is already folded into wq/bq in the wrapper.  One full-width bf16
    # cast per tensor (lane-dense) instead of H narrow per-head casts.
    Q = (jnp.dot(xq, wq_ref[...], preferred_element_type=jnp.float32)
         + bq_ref[...]).astype(jnp.bfloat16)
    K = (jnp.dot(xk, wk_ref[...], preferred_element_type=jnp.float32)
         + bk_ref[...]).astype(jnp.bfloat16)
    V = (jnp.dot(xv, wv_ref[...], preferred_element_type=jnp.float32)
         + bv_ref[...]).astype(jnp.bfloat16)

    # Per-(batch, head) scaled dot-product attention (mask=None path).  Head h lives in
    # columns [h*d_k, (h+1)*d_k) — same head-major layout as the PyTorch .view().
    # TODO(synk): for long sequences, restructure as flash (grid over query tiles,
    # streamed K/V, online softmax) so the (S,S) scores never materialize — required
    # to fit v7x's 64 MiB VMEM at realistic S/E; tile 128 on v5e, 256 on v6e/v7x.
    # TODO(synk): for large num_heads, replace this unrolled Python loop with
    # lax.fori_loop over pl.ds(h*d_k, d_k) slices to bound vreg live ranges.
    contract_last = (((1,), (1,)), ((), ()))
    batch_ctx = []
    for b in range(Bb):
        rows = slice(b * S, (b + 1) * S)
        head_ctx = []
        for h in range(num_heads):
            cols = slice(h * d_k, (h + 1) * d_k)
            qh = Q[rows, cols]                       # (S, d_k) bf16
            kh = K[rows, cols]
            vh = V[rows, cols]

            s = lax.dot_general(qh, kh, contract_last,
                                preferred_element_type=jnp.float32)   # (S, S) f32
            s = s - jnp.max(s, axis=-1, keepdims=True)
            p = jnp.exp(s)
            p = p * pl.reciprocal(jnp.sum(p, axis=-1, keepdims=True), approx=True)
            # TODO(synk): nn.Dropout(0.1) on attention weights omitted (eval-mode identity).

            head_ctx.append(jnp.dot(p.astype(jnp.bfloat16), vh,
                                    preferred_element_type=jnp.float32))  # (S, d_k)
        batch_ctx.append(jnp.concatenate(head_ctx, axis=-1))             # (S, E)

    ctx = jnp.concatenate(batch_ctx, axis=0).astype(jnp.bfloat16)         # (Bb*S, E)

    # Single fused output projection and one lane-dense output write.
    out = jnp.dot(ctx, wo_ref[...], preferred_element_type=jnp.float32) + bo_ref[...]
    o_ref[...] = out.reshape(Bb, S, E)


def _pick_batch_block(B, S):
    """Pack batch elements per grid step to amortize per-step overhead and fill MXU rows,
    but keep >=2 grid steps when B allows (two TensorCores on v7x)."""
    bb = 1
    for d in range(1, B + 1):
        if B % d:
            continue
        if d * S <= 256 and (B // d >= 2 or B == 1):
            bb = d
    return bb


def multi_head_attention_pallas(query, key, value, params, num_heads, batch_block=None):
    B, S, E = query.shape
    H = num_heads
    d_k = E // H
    scale = 1.0 / math.sqrt(d_k)

    if batch_block is None:
        batch_block = _pick_batch_block(B, S)
    assert B % batch_block == 0
    grid_b = B // batch_block

    # bf16 activations: halves HBM traffic; numerics unchanged (MXU already fed bf16).
    q_in = query.astype(jnp.bfloat16)
    k_in = key.astype(jnp.bfloat16)
    v_in = value.astype(jnp.bfloat16)

    # Pre-transpose nn.Linear weights ((out,in) -> (in,out)) and fold the 1/sqrt(d_k)
    # softmax scale into W_q AND b_q.  bf16 weights, f32 biases (added post-accumulation).
    wq = (params["wq"].T * scale).astype(jnp.bfloat16)    # (E, E)
    wk = params["wk"].T.astype(jnp.bfloat16)
    wv = params["wv"].T.astype(jnp.bfloat16)
    wo = params["wo"].T.astype(jnp.bfloat16)
    bq = (params["bq"] * scale).reshape(1, E)
    bk = params["bk"].reshape(1, E)
    bv = params["bv"].reshape(1, E)
    bo = params["bo"].reshape(1, E)

    x_spec = pl.BlockSpec((batch_block, S, E), lambda b: (b, 0, 0))
    # Constant block index -> weights/biases DMA'd once and resident across the grid.
    # TODO(synk): single-buffer these (pipeline_mode=pl.Buffered(1)) once stable; the
    # default double-buffering doubles resident-weight VMEM (matters at E >= 1024).
    w_spec = pl.BlockSpec((E, E), lambda b: (0, 0))
    b_spec = pl.BlockSpec((1, E), lambda b: (0, 0))

    # Explicit VMEM budget (counting the default double-buffering on every input).
    weight_bytes = 2 * (4 * E * E * 2 + 4 * E * 4)
    act_bytes = 2 * (3 * batch_block * S * E * 2 + batch_block * S * E * 4)
    interm_bytes = 4 * batch_block * S * E * 4 + batch_block * S * S * 4
    vmem_limit = int(min(64 << 20, max(32 << 20,
                                       2 * (weight_bytes + act_bytes + interm_bytes))))

    kernel = functools.partial(_mha_kernel, H, d_k, batch_block, S)

    return pl.pallas_call(
        kernel,
        out_shape=jax.ShapeDtypeStruct((B, S, E), jnp.float32),
        grid_spec=pltpu.PrefetchScalarGridSpec(
            num_scalar_prefetch=0,
            grid=(grid_b,),
            in_specs=[x_spec, x_spec, x_spec,
                      w_spec, w_spec, w_spec, w_spec,
                      b_spec, b_spec, b_spec, b_spec],
            out_specs=pl.BlockSpec((batch_block, S, E), lambda b: (b, 0, 0)),
        ),
        compiler_params=pltpu.CompilerParams(
            dimension_semantics=("parallel",),
            vmem_limit_bytes=vmem_limit),
    )(q_in, k_in, v_in, wq, wk, wv, wo, bq, bk, bv, bo)


def multi_head_attention_ref(query, key, value, params, num_heads):
    """Plain-JAX f32 reference mirroring the PyTorch forward (mask=None, eval mode)."""
    B, S, E = query.shape
    H = num_heads
    d_k = E // H

    def lin(x, w, b):
        return x @ w.T + b

    Q = lin(query, params["wq"], params["bq"]).reshape(B, S, H, d_k).transpose(0, 2, 1, 3)
    K = lin(key, params["wk"], params["bk"]).reshape(B, S, H, d_k).transpose(0, 2, 1, 3)
    V = lin(value, params["wv"], params["bv"]).reshape(B, S, H, d_k).transpose(0, 2, 1, 3)

    scores = jnp.einsum("bhqd,bhkd->bhqk", Q, K) / math.sqrt(d_k)
    attn = jax.nn.softmax(scores, axis=-1)
    ctx = jnp.einsum("bhqk,bhkd->bhqd", attn, V)
    ctx = ctx.transpose(0, 2, 1, 3).reshape(B, S, E)
    return lin(ctx, params["wo"], params["bo"])


def init_params(key, embed_dim):
    """Deterministic init mimicking torch.nn.Linear default: U(-1/sqrt(fan_in), +)."""
    bound = 1.0 / math.sqrt(embed_dim)
    names = ["wq", "bq", "wk", "bk", "wv", "bv", "wo", "bo"]
    keys = jax.random.split(key, len(names))
    params = {}
    for name, k in zip(names, keys):
        shape = (embed_dim, embed_dim) if name.startswith("w") else (embed_dim,)
        params[name] = jax.random.uniform(k, shape, jnp.float32, -bound, bound)
    return params


if __name__ == "__main__":
    B, S, E, H = 2, 8, 32, 4

    root = jax.random.PRNGKey(0)
    kq, kk, kv, kp = jax.random.split(root, 4)
    query = jax.random.normal(kq, (B, S, E), jnp.float32)
    key_in = jax.random.normal(kk, (B, S, E), jnp.float32)
    value = jax.random.normal(kv, (B, S, E), jnp.float32)
    params = init_params(kp, E)

    out = multi_head_attention_pallas(query, key_in, value, params, H)
    out = jax.block_until_ready(out)

    ref = multi_head_attention_ref(query, key_in, value, params, H)
    # Loose tolerance: kernel uses bf16 activations/weights on the MXU (f32 accumulation)
    # and an approximate softmax reciprocal.
    np.testing.assert_allclose(np.asarray(out), np.asarray(ref), rtol=3e-2, atol=3e-2)

    print("KERNEL_OK")
</pallas_src>

<mosaic_0001>
module attributes {stable_mosaic.version = 11 : i64} {
  func.func @_mha_kernel(%arg0: i32, %arg1: memref<1x8x32xbf16, #tpu.memory_space<vmem>>, %arg2: memref<1x8x32xbf16, #tpu.memory_space<vmem>>, %arg3: memref<1x8x32xbf16, #tpu.memory_space<vmem>>, %arg4: memref<32x32xbf16, #tpu.memory_space<vmem>>, %arg5: memref<32x32xbf16, #tpu.memory_space<vmem>>, %arg6: memref<32x32xbf16, #tpu.memory_space<vmem>>, %arg7: memref<32x32xbf16, #tpu.memory_space<vmem>>, %arg8: memref<1x32xf32, #tpu.memory_space<vmem>>, %arg9: memref<1x32xf32, #tpu.memory_space<vmem>>, %arg10: memref<1x32xf32, #tpu.memory_space<vmem>>, %arg11: memref<1x32xf32, #tpu.memory_space<vmem>>, %arg12: memref<1x8x32xf32, #tpu.memory_space<vmem>>) attributes {dimension_semantics = [#tpu.dimension_semantics<parallel>], iteration_bounds = array<i64: 2>, scalar_prefetch = 0 : i64, scratch_operands = 0 : i64, tpu.core_type = #tpu.core_type<tc>, window_params = [{transform_indices = @transform_0, window_bounds = array<i64: 1, 8, 32>}, {transform_indices = @transform_1, window_bounds = array<i64: 1, 8, 32>}, {transform_indices = @transform_2, window_bounds = array<i64: 1, 8, 32>}, {pipeline_mode = #tpu.pipeline_mode<synchronous>, transform_indices = @transform_3, window_bounds = array<i64: 32, 32>}, {pipeline_mode = #tpu.pipeline_mode<synchronous>, transform_indices = @transform_4, window_bounds = array<i64: 32, 32>}, {pipeline_mode = #tpu.pipeline_mode<synchronous>, transform_indices = @transform_5, window_bounds = array<i64: 32, 32>}, {pipeline_mode = #tpu.pipeline_mode<synchronous>, transform_indices = @transform_6, window_bounds = array<i64: 32, 32>}, {pipeline_mode = #tpu.pipeline_mode<synchronous>, transform_indices = @transform_7, window_bounds = array<i64: 1, 32>}, {pipeline_mode = #tpu.pipeline_mode<synchronous>, transform_indices = @transform_8, window_bounds = array<i64: 1, 32>}, {pipeline_mode = #tpu.pipeline_mode<synchronous>, transform_indices = @transform_9, window_bounds = array<i64: 1, 32>}, {pipeline_mode = #tpu.pipeline_mode<synchronous>, transform_indices = @transform_10, window_bounds = array<i64: 1, 32>}, {transform_indices = @transform_11, window_bounds = array<i64: 1, 8, 32>}]} {
    %c0 = arith.constant 0 : index
    %c0_0 = arith.constant 0 : index
    %c0_1 = arith.constant 0 : index
    %0 = vector.load %arg1[%c0, %c0_0, %c0_1] : memref<1x8x32xbf16, #tpu.memory_space<vmem>>, vector<1x8x32xbf16>
    %1 = vector.shape_cast %0 : vector<1x8x32xbf16> to vector<8x32xbf16>
    %c0_2 = arith.constant 0 : index
    %c0_3 = arith.constant 0 : index
    %c0_4 = arith.constant 0 : index
    %2 = vector.load %arg2[%c0_2, %c0_3, %c0_4] : memref<1x8x32xbf16, #tpu.memory_space<vmem>>, vector<1x8x32xbf16>
    %3 = vector.shape_cast %2 : vector<1x8x32xbf16> to vector<8x32xbf16>
    %c0_5 = arith.constant 0 : index
    %c0_6 = arith.constant 0 : index
    %c0_7 = arith.constant 0 : index
    %4 = vector.load %arg3[%c0_5, %c0_6, %c0_7] : memref<1x8x32xbf16, #tpu.memory_space<vmem>>, vector<1x8x32xbf16>
    %5 = vector.shape_cast %4 : vector<1x8x32xbf16> to vector<8x32xbf16>
    %c0_8 = arith.constant 0 : index
    %c0_9 = arith.constant 0 : index
    %6 = vector.load %arg4[%c0_8, %c0_9] : memref<32x32xbf16, #tpu.memory_space<vmem>>, vector<32x32xbf16>
    %cst = arith.constant dense<0.000000e+00> : vector<8x32xf32>
    %7 = tpu.matmul %1, %6, %cst {dimension_numbers = #tpu.dot_dimension_numbers<[1], [0], [0], [1], [0, 0, 1, 1], [], []>} : vector<8x32xbf16>, vector<32x32xbf16>, vector<8x32xf32> -> vector<8x32xf32>
    %c0_10 = arith.constant 0 : index
    %c0_11 = arith.constant 0 : index
    %8 = vector.load %arg8[%c0_10, %c0_11] : memref<1x32xf32, #tpu.memory_space<vmem>>, vector<1x32xf32>
    %9 = vector.broadcast %8 : vector<1x32xf32> to vector<8x32xf32>
    %10 = arith.addf %7, %9 : vector<8x32xf32>
    %11 = arith.truncf %10 : vector<8x32xf32> to vector<8x32xbf16>
    %c0_12 = arith.constant 0 : index
    %c0_13 = arith.constant 0 : index
    %12 = vector.load %arg5[%c0_12, %c0_13] : memref<32x32xbf16, #tpu.memory_space<vmem>>, vector<32x32xbf16>
    %cst_14 = arith.constant dense<0.000000e+00> : vector<8x32xf32>
    %13 = tpu.matmul %3, %12, %cst_14 {dimension_numbers = #tpu.dot_dimension_numbers<[1], [0], [0], [1], [0, 0, 1, 1], [], []>} : vector<8x32xbf16>, vector<32x32xbf16>, vector<8x32xf32> -> vector<8x32xf32>
    %c0_15 = arith.constant 0 : index
    %c0_16 = arith.constant 0 : index
    %14 = vector.load %arg9[%c0_15, %c0_16] : memref<1x32xf32, #tpu.memory_space<vmem>>, vector<1x32xf32>
    %15 = vector.broadcast %14 : vector<1x32xf32> to vector<8x32xf32>
    %16 = arith.addf %13, %15 : vector<8x32xf32>
    %17 = arith.truncf %16 : vector<8x32xf32> to vector<8x32xbf16>
    %c0_17 = arith.constant 0 : index
    %c0_18 = arith.constant 0 : index
    %18 = vector.load %arg6[%c0_17, %c0_18] : memref<32x32xbf16, #tpu.memory_space<vmem>>, vector<32x32xbf16>
    %cst_19 = arith.constant dense<0.000000e+00> : vector<8x32xf32>
    %19 = tpu.matmul %5, %18, %cst_19 {dimension_numbers = #tpu.dot_dimension_numbers<[1], [0], [0], [1], [0, 0, 1, 1], [], []>} : vector<8x32xbf16>, vector<32x32xbf16>, vector<8x32xf32> -> vector<8x32xf32>
    %c0_20 = arith.constant 0 : index
    %c0_21 = arith.constant 0 : index
    %20 = vector.load %arg10[%c0_20, %c0_21] : memref<1x32xf32, #tpu.memory_space<vmem>>, vector<1x32xf32>
    %21 = vector.broadcast %20 : vector<1x32xf32> to vector<8x32xf32>
    %22 = arith.addf %19, %21 : vector<8x32xf32>
    %23 = arith.truncf %22 : vector<8x32xf32> to vector<8x32xbf16>
    %24 = vector.extract_strided_slice %11 {offsets = [0, 0], sizes = [8, 8], strides = [1, 1]} : vector<8x32xbf16> to vector<8x8xbf16>
    %25 = vector.extract_strided_slice %17 {offsets = [0, 0], sizes = [8, 8], strides = [1, 1]} : vector<8x32xbf16> to vector<8x8xbf16>
    %26 = vector.extract_strided_slice %23 {offsets = [0, 0], sizes = [8, 8], strides = [1, 1]} : vector<8x32xbf16> to vector<8x8xbf16>
    %cst_22 = arith.constant dense<0.000000e+00> : vector<8x8xf32>
    %27 = tpu.matmul %24, %25, %cst_22 {dimension_numbers = #tpu.dot_dimension_numbers<[1], [1], [0], [0], [0, 0, 1, 0], [], []>} : vector<8x8xbf16>, vector<8x8xbf16>, vector<8x8xf32> -> vector<8x8xf32>
    %cst_23 = arith.constant dense<0xFF800000> : vector<8xf32>
    %28 = vector.multi_reduction <maximumf>, %27, %cst_23 [1] : vector<8x8xf32> to vector<8xf32>
    %29 = vector.shape_cast %28 : vector<8xf32> to vector<8x1xf32>
    %30 = vector.broadcast %29 : vector<8x1xf32> to vector<8x8xf32>
    %31 = arith.subf %27, %30 : vector<8x8xf32>
    %32 = math.exp %31 : vector<8x8xf32>
    %cst_24 = arith.constant dense<0.000000e+00> : vector<8xf32>
    %33 = vector.multi_reduction <add>, %32, %cst_24 [1] : vector<8x8xf32> to vector<8xf32>
    %34 = vector.shape_cast %33 : vector<8xf32> to vector<8x1xf32>
    %35 = tpu.reciprocal %34 {approx = true} : vector<8x1xf32> -> vector<8x1xf32>
    %36 = vector.broadcast %35 : vector<8x1xf32> to vector<8x8xf32>
    %37 = arith.mulf %32, %36 : vector<8x8xf32>
    %38 = arith.truncf %37 : vector<8x8xf32> to vector<8x8xbf16>
    %cst_25 = arith.constant dense<0.000000e+00> : vector<8x8xf32>
    %39 = tpu.matmul %38, %26, %cst_25 {dimension_numbers = #tpu.dot_dimension_numbers<[1], [0], [0], [1], [0, 0, 1, 1], [], []>} : vector<8x8xbf16>, vector<8x8xbf16>, vector<8x8xf32> -> vector<8x8xf32>
    %40 = vector.extract_strided_slice %11 {offsets = [0, 8], sizes = [8, 8], strides = [1, 1]} : vector<8x32xbf16> to vector<8x8xbf16>
    %41 = vector.extract_strided_slice %17 {offsets = [0, 8], sizes = [8, 8], strides = [1, 1]} : vector<8x32xbf16> to vector<8x8xbf16>
    %42 = vector.extract_strided_slice %23 {offsets = [0, 8], sizes = [8, 8], strides = [1, 1]} : vector<8x32xbf16> to vector<8x8xbf16>
    %cst_26 = arith.constant dense<0.000000e+00> : vector<8x8xf32>
    %43 = tpu.matmul %40, %41, %cst_26 {dimension_numbers = #tpu.dot_dimension_numbers<[1], [1], [0], [0], [0, 0, 1, 0], [], []>} : vector<8x8xbf16>, vector<8x8xbf16>, vector<8x8xf32> -> vector<8x8xf32>
    %cst_27 = arith.constant dense<0xFF800000> : vector<8xf32>
    %44 = vector.multi_reduction <maximumf>, %43, %cst_27 [1] : vector<8x8xf32> to vector<8xf32>
    %45 = vector.shape_cast %44 : vector<8xf32> to vector<8x1xf32>
    %46 = vector.broadcast %45 : vector<8x1xf32> to vector<8x8xf32>
    %47 = arith.subf %43, %46 : vector<8x8xf32>
    %48 = math.exp %47 : vector<8x8xf32>
    %cst_28 = arith.constant dense<0.000000e+00> : vector<8xf32>
    %49 = vector.multi_reduction <add>, %48, %cst_28 [1] : vector<8x8xf32> to vector<8xf32>
    %50 = vector.shape_cast %49 : vector<8xf32> to vector<8x1xf32>
    %51 = tpu.reciprocal %50 {approx = true} : vector<8x1xf32> -> vector<8x1xf32>
    %52 = vector.broadcast %51 : vector<8x1xf32> to vector<8x8xf32>
    %53 = arith.mulf %48, %52 : vector<8x8xf32>
    %54 = arith.truncf %53 : vector<8x8xf32> to vector<8x8xbf16>
    %cst_29 = arith.constant dense<0.000000e+00> : vector<8x8xf32>
    %55 = tpu.matmul %54, %42, %cst_29 {dimension_numbers = #tpu.dot_dimension_numbers<[1], [0], [0], [1], [0, 0, 1, 1], [], []>} : vector<8x8xbf16>, vector<8x8xbf16>, vector<8x8xf32> -> vector<8x8xf32>
    %56 = vector.extract_strided_slice %11 {offsets = [0, 16], sizes = [8, 8], strides = [1, 1]} : vector<8x32xbf16> to vector<8x8xbf16>
    %57 = vector.extract_strided_slice %17 {offsets = [0, 16], sizes = [8, 8], strides = [1, 1]} : vector<8x32xbf16> to vector<8x8xbf16>
    %58 = vector.extract_strided_slice %23 {offsets = [0, 16], sizes = [8, 8], strides = [1, 1]} : vector<8x32xbf16> to vector<8x8xbf16>
    %cst_30 = arith.constant dense<0.000000e+00> : vector<8x8xf32>
    %59 = tpu.matmul %56, %57, %cst_30 {dimension_numbers = #tpu.dot_dimension_numbers<[1], [1], [0], [0], [0, 0, 1, 0], [], []>} : vector<8x8xbf16>, vector<8x8xbf16>, vector<8x8xf32> -> vector<8x8xf32>
    %cst_31 = arith.constant dense<0xFF800000> : vector<8xf32>
    %60 = vector.multi_reduction <maximumf>, %59, %cst_31 [1] : vector<8x8xf32> to vector<8xf32>
    %61 = vector.shape_cast %60 : vector<8xf32> to vector<8x1xf32>
    %62 = vector.broadcast %61 : vector<8x1xf32> to vector<8x8xf32>
    %63 = arith.subf %59, %62 : vector<8x8xf32>
    %64 = math.exp %63 : vector<8x8xf32>
    %cst_32 = arith.constant dense<0.000000e+00> : vector<8xf32>
    %65 = vector.multi_reduction <add>, %64, %cst_32 [1] : vector<8x8xf32> to vector<8xf32>
    %66 = vector.shape_cast %65 : vector<8xf32> to vector<8x1xf32>
    %67 = tpu.reciprocal %66 {approx = true} : vector<8x1xf32> -> vector<8x1xf32>
    %68 = vector.broadcast %67 : vector<8x1xf32> to vector<8x8xf32>
    %69 = arith.mulf %64, %68 : vector<8x8xf32>
    %70 = arith.truncf %69 : vector<8x8xf32> to vector<8x8xbf16>
    %cst_33 = arith.constant dense<0.000000e+00> : vector<8x8xf32>
    %71 = tpu.matmul %70, %58, %cst_33 {dimension_numbers = #tpu.dot_dimension_numbers<[1], [0], [0], [1], [0, 0, 1, 1], [], []>} : vector<8x8xbf16>, vector<8x8xbf16>, vector<8x8xf32> -> vector<8x8xf32>
    %72 = vector.extract_strided_slice %11 {offsets = [0, 24], sizes = [8, 8], strides = [1, 1]} : vector<8x32xbf16> to vector<8x8xbf16>
    %73 = vector.extract_strided_slice %17 {offsets = [0, 24], sizes = [8, 8], strides = [1, 1]} : vector<8x32xbf16> to vector<8x8xbf16>
    %74 = vector.extract_strided_slice %23 {offsets = [0, 24], sizes = [8, 8], strides = [1, 1]} : vector<8x32xbf16> to vector<8x8xbf16>
    %cst_34 = arith.constant dense<0.000000e+00> : vector<8x8xf32>
    %75 = tpu.matmul %72, %73, %cst_34 {dimension_numbers = #tpu.dot_dimension_numbers<[1], [1], [0], [0], [0, 0, 1, 0], [], []>} : vector<8x8xbf16>, vector<8x8xbf16>, vector<8x8xf32> -> vector<8x8xf32>
    %cst_35 = arith.constant dense<0xFF800000> : vector<8xf32>
    %76 = vector.multi_reduction <maximumf>, %75, %cst_35 [1] : vector<8x8xf32> to vector<8xf32>
    %77 = vector.shape_cast %76 : vector<8xf32> to vector<8x1xf32>
    %78 = vector.broadcast %77 : vector<8x1xf32> to vector<8x8xf32>
    %79 = arith.subf %75, %78 : vector<8x8xf32>
    %80 = math.exp %79 : vector<8x8xf32>
    %cst_36 = arith.constant dense<0.000000e+00> : vector<8xf32>
    %81 = vector.multi_reduction <add>, %80, %cst_36 [1] : vector<8x8xf32> to vector<8xf32>
    %82 = vector.shape_cast %81 : vector<8xf32> to vector<8x1xf32>
    %83 = tpu.reciprocal %82 {approx = true} : vector<8x1xf32> -> vector<8x1xf32>
    %84 = vector.broadcast %83 : vector<8x1xf32> to vector<8x8xf32>
    %85 = arith.mulf %80, %84 : vector<8x8xf32>
    %86 = arith.truncf %85 : vector<8x8xf32> to vector<8x8xbf16>
    %cst_37 = arith.constant dense<0.000000e+00> : vector<8x8xf32>
    %87 = tpu.matmul %86, %74, %cst_37 {dimension_numbers = #tpu.dot_dimension_numbers<[1], [0], [0], [1], [0, 0, 1, 1], [], []>} : vector<8x8xbf16>, vector<8x8xbf16>, vector<8x8xf32> -> vector<8x8xf32>
    %88 = tpu.concatenate %39, %55, %71, %87 in 1 : vector<8x8xf32>, vector<8x8xf32>, vector<8x8xf32>, vector<8x8xf32> -> vector<8x32xf32>
    %89 = arith.truncf %88 : vector<8x32xf32> to vector<8x32xbf16>
    %c0_38 = arith.constant 0 : index
    %c0_39 = arith.constant 0 : index
    %90 = vector.load %arg7[%c0_38, %c0_39] : memref<32x32xbf16, #tpu.memory_space<vmem>>, vector<32x32xbf16>
    %cst_40 = arith.constant dense<0.000000e+00> : vector<8x32xf32>
    %91 = tpu.matmul %89, %90, %cst_40 {dimension_numbers = #tpu.dot_dimension_numbers<[1], [0], [0], [1], [0, 0, 1, 1], [], []>} : vector<8x32xbf16>, vector<32x32xbf16>, vector<8x32xf32> -> vector<8x32xf32>
    %c0_41 = arith.constant 0 : index
    %c0_42 = arith.constant 0 : index
    %92 = vector.load %arg11[%c0_41, %c0_42] : memref<1x32xf32, #tpu.memory_space<vmem>>, vector<1x32xf32>
    %93 = vector.broadcast %92 : vector<1x32xf32> to vector<8x32xf32>
    %94 = arith.addf %91, %93 : vector<8x32xf32>
    %95 = vector.shape_cast %94 : vector<8x32xf32> to vector<1x8x32xf32>
    %c0_43 = arith.constant 0 : index
    %c0_44 = arith.constant 0 : index
    %c0_45 = arith.constant 0 : index
    %96 = vector.load %arg12[%c0_43, %c0_44, %c0_45] : memref<1x8x32xf32, #tpu.memory_space<vmem>>, vector<1x8x32xf32>
    tpu.vector_store %arg12[%c0_43, %c0_44, %c0_45], %95 {strides = array<i32>} : memref<1x8x32xf32, #tpu.memory_space<vmem>>, vector<1x8x32xf32>,
    return
  }
  func.func @transform_0(%arg0: i32) -> (i32, i32, i32) {
    %c0_i32 = arith.constant 0 : i32
    %c0_i32_0 = arith.constant 0 : i32
    %c0_i32_1 = arith.constant 0 : i32
    return %arg0, %c0_i32, %c0_i32_0 : i32, i32, i32
  }
  func.func @transform_1(%arg0: i32) -> (i32, i32, i32) {
    %c0_i32 = arith.constant 0 : i32
    %c0_i32_0 = arith.constant 0 : i32
    %c0_i32_1 = arith.constant 0 : i32
    return %arg0, %c0_i32, %c0_i32_0 : i32, i32, i32
  }
  func.func @transform_2(%arg0: i32) -> (i32, i32, i32) {
    %c0_i32 = arith.constant 0 : i32
    %c0_i32_0 = arith.constant 0 : i32
    %c0_i32_1 = arith.constant 0 : i32
    return %arg0, %c0_i32, %c0_i32_0 : i32, i32, i32
  }
  func.func @transform_3(%arg0: i32) -> (i32, i32) {
    %c0_i32 = arith.constant 0 : i32
    %c0_i32_0 = arith.constant 0 : i32
    %c0_i32_1 = arith.constant 0 : i32
    return %c0_i32, %c0_i32_0 : i32, i32
  }
  func.func @transform_4(%arg0: i32) -> (i32, i32) {
    %c0_i32 = arith.constant 0 : i32
    %c0_i32_0 = arith.constant 0 : i32
    %c0_i32_1 = arith.constant 0 : i32
    return %c0_i32, %c0_i32_0 : i32, i32
  }
  func.func @transform_5(%arg0: i32) -> (i32, i32) {
    %c0_i32 = arith.constant 0 : i32
    %c0_i32_0 = arith.constant 0 : i32
    %c0_i32_1 = arith.constant 0 : i32
    return %c0_i32, %c0_i32_0 : i32, i32
  }
  func.func @transform_6(%arg0: i32) -> (i32, i32) {
    %c0_i32 = arith.constant 0 : i32
    %c0_i32_0 = arith.constant 0 : i32
    %c0_i32_1 = arith.constant 0 : i32
    return %c0_i32, %c0_i32_0 : i32, i32
  }
  func.func @transform_7(%arg0: i32) -> (i32, i32) {
    %c0_i32 = arith.constant 0 : i32
    %c0_i32_0 = arith.constant 0 : i32
    %c0_i32_1 = arith.constant 0 : i32
    return %c0_i32, %c0_i32_0 : i32, i32
  }
  func.func @transform_8(%arg0: i32) -> (i32, i32) {
    %c0_i32 = arith.constant 0 : i32
    %c0_i32_0 = arith.constant 0 : i32
    %c0_i32_1 = arith.constant 0 : i32
    return %c0_i32, %c0_i32_0 : i32, i32
  }
  func.func @transform_9(%arg0: i32) -> (i32, i32) {
    %c0_i32 = arith.constant 0 : i32
    %c0_i32_0 = arith.constant 0 : i32
    %c0_i32_1 = arith.constant 0 : i32
    return %c0_i32, %c0_i32_0 : i32, i32
  }
  func.func @transform_10(%arg0: i32) -> (i32, i32) {
    %c0_i32 = arith.constant 0 : i32
    %c0_i32_0 = arith.constant 0 : i32
    %c0_i32_1 = arith.constant 0 : i32
    return %c0_i32, %c0_i32_0 : i32, i32
  }
  func.func @transform_11(%arg0: i32) -> (i32, i32, i32) {
    %c0_i32 = arith.constant 0 : i32
    %c0_i32_0 = arith.constant 0 : i32
    %c0_i32_1 = arith.constant 0 : i32
    return %arg0, %c0_i32, %c0_i32_0 : i32, i32, i32
  }
}

</mosaic_0001>

<bundles_post_ra>
// kernel: tpu_custom_call.1
= control target key start
LH: loop header
LB: loop body
LE: loop exit
PB: predicated region body
PF: predicated region fallthrough
CT: control target
= control target key end

     0   :  { %s1964_s0 = inlined_call_operand.hbm [shape: bf16[2,8,32], index: 0, kind: input, shape index: {}]   ;;  %s1965_s1 = inlined_call_operand.hbm [shape: bf16[2,8,32], index: 1, kind: input, shape index: {}]   ;;  %s1966_s2 = inlined_call_operand.hbm [shape: bf16[2,8,32], index: 2, kind: input, shape index: {}]   ;;  %s1967_s3 = inlined_call_operand.hbm [shape: bf16[32,32], index: 3, kind: input, shape index: {}]   ;;  %s1968_s4 = inlined_call_operand.hbm [shape: bf16[32,32], index: 4, kind: input, shape index: {}]   ;;  %s1969_s5 = inlined_call_operand.hbm [shape: bf16[32,32], index: 5, kind: input, shape index: {}]   ;;  %s1970_s6 = inlined_call_operand.hbm [shape: bf16[32,32], index: 6, kind: input, shape index: {}]   ;;  %s1971_s7 = inlined_call_operand.vmem [shape: f32[1,32], index: 7, kind: input, shape index: {}]   ;;  %s1972_s8 = inlined_call_operand.vmem [shape: f32[1,32], index: 8, kind: input, shape index: {}]   ;;  %s1973_s9 = inlined_call_operand.vmem [shape: f32[1,32], index: 9, kind: input, shape index: {}]   ;;  %s1974_s10 = inlined_call_operand.vmem [shape: f32[1,32], index: 10, kind: input, shape index: {}]   ;;  %s1975_s11 = inlined_call_operand.hbm [shape: f32[2,8,32], index: 11, kind: output, shape index: {}]  }
   0x1   :  { %1987 = sst [smem:[#allocation25_spill]] %s1965_s1 }
   0x2   :  { %1988 = sst [smem:[#allocation26_spill]] %s1967_s3 }
   0x3   :  { %1989 = sst [smem:[#allocation27_spill]] %s1968_s4 }
   0x4   :  { %1990 = sst [smem:[#allocation28_spill]] %s1969_s5 }
   0x5   :  { %1991 = sst [smem:[#allocation29_spill]] %s1970_s6 }
   0x6   :  { %1992 = sst [smem:[#allocation30_spill]] %s1974_s10 }
   0x7   :  { %16 = vsyncpa [#allocation3], 0 }
   0x8   :  { %18 = vsyncpa [#allocation3 + $0x1], 0 }
   0x9   :  { %19 = vsyncpa [#allocation6], 0 }
   0xa   :  { %21 = vsyncpa [#allocation6 + $0x1], 0 }
   0xb   :  { %22 = vsyncpa [#allocation9], 0 }
   0xc   :  { %23 = vsyncpa [#allocation12], 0 }
   0xd   :  { %24 = vsyncpa [#allocation4], 0 }
   0xe   :  { %26 = vsyncpa [#allocation4 + $0x1], 0  ;;  %s1677_s17 = smov 0   ;;  %s1679_s18 = smov 0  }
   0xf   :  { %s1681_s19 = smov 0   ;;  %s1683_s20 = smov 0  }
  0x10 LB: > { %1993 = sst [smem:[#allocation20_spill]] %s1591_s17  ;;  %s1701_s24 = sadd.s32 4294967295, %s1603_s20   ;;  %s1603_s20 = sphi %s1683_s20, %s2021_s20   ;;  %s1599_s19 = sphi %s1681_s19, %s2025_s19   ;;  %s1595_s18 = sphi %s1679_s18, %s2024_s18   ;;  %s1591_s17 = sphi %s1677_s17, %s2023_s17  }
  0x11   : > { %1994 = sst [smem:[#allocation21_spill]] %s1603_s20  ;;  %p1113_p0 = scmp.ge.s32.totalorder %s1603_s20, 1 }
  0x12   : > { %s1995_s3 = sld [smem:[#allocation26_spill]]  ;;  %p1986_p1 = scmp.eq.s32.totalorder %s1701_s24, 0 }
  0x13   : > { %p309_p2 = scmp.lt.s32.totalorder %s1603_s20, 3  ;;  %s1605_s26 = smov [#allocation8]  }
  0x14   : > { %s322_s27 = sshll.u32 %s1605_s26, 4  ;;  %s1997_s5 = sld [smem:[#allocation28_spill]]  ;;  %s323_s27 = int_to_ptr.vmem [resolvable:$true] %s322_s27 }
  0x15   : > { %p1706_p3 = pnand %p1113_p0, %p309_p2  ;;  %s1606_s13 = smov [#allocation11]  }
  0x16   : > { %s350_s14 = sshll.u32 %s1606_s13, 4  ;;  %s1976_s15 = smov 64   ;;  %s351_s14 = int_to_ptr.vmem [resolvable:$true] %s350_s14 }
  0x17   : > { %p1214_p4 = pneg %p1706_p3  ;;  %s1978_s16 = smov 4  }
  0x18   : > { %s320_s23 = sshll.u32 %s1995_s3, 4  ;;  %s1112_s21 = sadd.s32 4294967294, %s1603_s20   ;;  %s321_s23 = int_to_ptr.hbm [resolvable:$true] %s320_s23 }
  0x19   : > { %p1718_p6 = pnand %p1214_p4, %p1986_p1  ;;  %s1734_s22 = sadd.s32 1, %s1603_s20  }
  0x1a   : > { %s348_s30 = sshll.u32 %s1997_s5, 4  ;;  %1999 = sst [smem:[#allocation22_spill]] %s1734_s22  ;;  %s349_s30 = int_to_ptr.hbm [resolvable:$true] %s348_s30 }
  0x1b   : > { %1217 = dma.hbm_to_vmem [thread:$0]  (!%p1718_p6), %s321_s23, 256, %s323_s27, [#allocation9], %s1976_s15, %s1976_s15, %s1978_s16  }
  0x1c   : > { %1223 = dma.hbm_to_vmem [thread:$0]  (!%p1718_p6), %s349_s30, 256, %s351_s14, [#allocation12], %s1976_s15, %s1976_s15, %s1978_s16  }
  0x1d   : > { %s36_s26 = ssub.s32 %s1603_s20, %s1734_s22  ;;  %s39_s28 = sadd.s32 1, %s1599_s19 }
  0x1e   : > { %p37_p7 = scmp.eq.s32.totalorder %s36_s26, 0  ;;  %p46_p8 = scmp.ne.s32.totalorder %s1599_s19, %s1595_s18 }
  0x1f   : > { %p47_p9 = scmp.eq.s32.totalorder %s1603_s20, 0  ;;  %p52_p10 = scmp.ne.s32.totalorder %s1595_s18, %s1591_s17 }
  0x20   : > { %s1745_s23 = scalar_select %p37_p7, %s1599_s19, %s39_s28  }
  0x21   : > { %p48_p11 = por %p47_p9, %p46_p8  ;;  %p1749_p12 = por %p1986_p1, %p52_p10 }
  0x22   : > { %2000 = sst [smem:[#allocation23_spill]] %s1745_s23  ;;  %p296_p13 = scmp.eq.s32.totalorder %s1701_s24, 1 }
  0x23   : > { %p302_p0 = scmp.eq.s32.totalorder %s1112_s21, 1  ;;  %p1245_p2 = scmp.lt.s32.totalorder %s1603_s20, 2 }
  0x24   : > { %s1982_s29 = sand.u32 1, %s1599_s19   ;;  %p1756_p4 = por %p296_p13, %p46_p8 }
  0x25   : > { %p1760_p5 = por %p302_p0, %p52_p10  ;;  %s1766_s14 = sshll.u32 %s1982_s29, 2 }
  0x26   : > { %s1769_s26 = sshll.u32 %s1603_s20, 2  ;;  %p1771_p7 = pnand %p1245_p2, %p48_p11 }
  0x27   : > { %s2003_s13 = scalar_select %p1760_p5, 1, 0 }
  0x28   : > { %s409_s21 = sand.u32 1, %s1603_s20   ;;  %s2006_s1 = sld [smem:[#allocation25_spill]] }
  0x29   : > { %2004 = sst [smem:[#allocation24_spill]] %s2003_s13  ;;  %s413_s23 = scalar_lea.vmem [#allocation5], %s1766_s14 }
  0x2a   : > { %s421_s22 = sshll.u32 %s413_s23, 4  ;;  %s1781_s29 = scalar_lea.sflag [#allocation6], %s409_s21  ;;  %s422_s22 = int_to_ptr.vmem [resolvable:$true] %s421_s22 }
  0x2b   : > { %p1379_p9 = pneg %p1771_p7 }
  0x2e   : > { %s417_s3 = scalar_lea.hbm %s2006_s1, %s1769_s26 }
  0x2f   : > { %s419_s5 = sshll.u32 %s417_s3, 4  ;;  %s1382_s3 = scalar_lea.hbm %s2006_s1, 8  ;;  %s420_s5 = int_to_ptr.hbm [resolvable:$true] %s419_s5 }
  0x30   : > { %s1375_s13 = sshra.s32 %s420_s5, 4  ;;  %s1376_s13 = int_to_ptr.hbm [resolvable:$true] %s1375_s13 }
  0x31   : > { %s1377_s17 = scalar_lea.hbm %s1376_s13, 4  ;;  %p1383_p13 = scmp.lt.s32.totalorder %s1376_s13, %s2006_s1 }
  0x32   : > { %p1378_p8 = scmp.ne.s32.totalorder %s1376_s13, %s1377_s17  ;;  %p1384_p0 = scmp.lt.s32.totalorder %s1382_s3, %s1377_s17 }
  0x34   : > { %p1380_p10 = pnand %p1379_p9, %p1378_p8  ;;  %p1385_p2 = por %p1384_p0, %p1383_p13 }
  0x36   : > { %p1381_p11 = pneg %p1380_p10 }
  0x38   : > { %p1386_p1 = pnand %p1385_p2, %p1381_p11 }
  0x3a   : > { %1389 = shalt.err (!%p1386_p1)
}
  0x3b   : > { %1233 = dma.hbm_to_vmem [thread:$0]  (!%p1771_p7), %s420_s5, 64, %s422_s22, %s1781_s29  }
  0x3c   : > { %s2007_s4 = sld [smem:[#allocation27_spill]]  ;;  %s1609_s15 = smov [#allocation10]  }
  0x3d   : > { %s336_s13 = sshll.u32 %s1609_s15, 4  ;;  %s2008_s6 = sld [smem:[#allocation29_spill]]  ;;  %s337_s13 = int_to_ptr.vmem [resolvable:$true] %s336_s13 }
  0x3e   : > { %s2009_s23 = smov 4   ;;  %s2010_s1 = smov 64  }
  0x3f   : > { %s1610_s5 = smov [#allocation13]   ;;  %s398_s15 = scalar_lea.hbm %s1964_s0, %s1769_s26 }
  0x40   : > { %s364_s22 = sshll.u32 %s1610_s5, 4  ;;  %s394_s17 = scalar_lea.vmem [#allocation2], %s1766_s14  ;;  %s365_s22 = int_to_ptr.vmem [resolvable:$true] %s364_s22 }
  0x41   : > { %s402_s3 = sshll.u32 %s394_s17, 4  ;;  %s403_s3 = int_to_ptr.vmem [resolvable:$true] %s402_s3 }
  0x42   : > { %s334_s20 = sshll.u32 %s2007_s4, 4  ;;  %s400_s4 = sshll.u32 %s398_s15, 4  ;;  %s335_s20 = int_to_ptr.hbm [resolvable:$true] %s334_s20  ;;  %s401_s4 = int_to_ptr.hbm [resolvable:$true] %s400_s4 }
  0x43   : > { %s362_s16 = sshll.u32 %s2008_s6, 4  ;;  %s1465_s6 = sshra.s32 %s401_s4, 4  ;;  %s363_s16 = int_to_ptr.hbm [resolvable:$true] %s362_s16  ;;  %s1466_s6 = int_to_ptr.hbm [resolvable:$true] %s1465_s6 }
  0x44   : > { %1220 = dma.hbm_to_vmem [thread:$0]  (!%p1718_p6), %s335_s20, 256, %s337_s13, [#allocation9], %s2010_s1, %s2010_s1, %s2009_s23  }
  0x45   : > { %1226 = dma.hbm_to_vmem [thread:$0]  (!%p1718_p6), %s363_s16, 256, %s365_s22, [#allocation12], %s2010_s1, %s2010_s1, %s2009_s23  }
  0x46   : > { %s2011_s20 = sand.u32 1, %s1599_s19   ;;  %s1467_s5 = scalar_lea.hbm %s1466_s6, 4 }
  0x47   : > { %s391_s13 = scalar_lea.sflag [#allocation3], %s2011_s20  ;;  %p1468_p1 = scmp.ne.s32.totalorder %s1466_s6, %s1467_s5 }
  0x48   : > { %s1472_s16 = scalar_lea.hbm %s1964_s0, 8  ;;  %p1473_p6 = scmp.lt.s32.totalorder %s1466_s6, %s1964_s0 }
  0x49   : > { %p1470_p8 = pnand %p1468_p1, %p1379_p9  ;;  %p1474_p11 = scmp.lt.s32.totalorder %s1472_s16, %s1467_s5 }
  0x4b   : > { %p1471_p10 = pneg %p1470_p8  ;;  %p1475_p13 = por %p1474_p11, %p1473_p6 }
  0x4d   : > { %p1476_p0 = pnand %p1475_p13, %p1471_p10 }
  0x4f   : > { %1479 = shalt.err (!%p1476_p0)
}
  0x50   : > { %1230 = dma.hbm_to_vmem [thread:$0]  (!%p1771_p7), %s401_s4, 64, %s403_s3, %s391_s13  }
  0x51   : > { %s436_s15 = scalar_lea.hbm %s1966_s2, %s1769_s26  ;;  %s432_s17 = scalar_lea.vmem [#allocation7], %s1766_s14 }
  0x52   : > { %s440_s20 = sshll.u32 %s432_s17, 4  ;;  %s438_s1 = sshll.u32 %s436_s15, 4  ;;  %s441_s20 = int_to_ptr.vmem [resolvable:$true] %s440_s20  ;;  %s439_s1 = int_to_ptr.hbm [resolvable:$true] %s438_s1 }
  0x53   : > { %s1495_s6 = sshra.s32 %s439_s1, 4  ;;  %s1502_s4 = scalar_lea.hbm %s1966_s2, 8  ;;  %s1496_s6 = int_to_ptr.hbm [resolvable:$true] %s1495_s6 }
  0x54   : > { %s1497_s5 = scalar_lea.hbm %s1496_s6, 4  ;;  %p1503_p10 = scmp.lt.s32.totalorder %s1496_s6, %s1966_s2 }
  0x55   : > { %p1498_p2 = scmp.ne.s32.totalorder %s1496_s6, %s1497_s5  ;;  %p1504_p6 = scmp.lt.s32.totalorder %s1502_s4, %s1497_s5 }
  0x57   : > { %p1500_p1 = pnand %p1498_p2, %p1379_p9  ;;  %p1505_p11 = por %p1504_p6, %p1503_p10 }
  0x59   : > { %p1501_p8 = pneg %p1500_p1 }
  0x5b   : > { %p1506_p13 = pnand %p1505_p11, %p1501_p8 }
  0x5d   : > { %1509 = shalt.err (!%p1506_p13)
}
  0x5e   : > { %1236 = dma.hbm_to_vmem [thread:$0]  (!%p1771_p7), %s439_s1, 64, %s441_s20, %s1781_s29  }
  0x5f   : > { %449 = sbr.rel (%p1706_p3) target bundleno = 1183 (0x49f), region = 64  ;;  %s1851_s14 = sand.u32 (!%p1706_p3), 1, %s1595_s18  }
  0x60   : > { %s1854_s26 = sshll.u32 (!%p1706_p3), %s1851_s14, 2  ;;  %s452_s23 = scalar_lea.sflag (!%p1706_p3), [#allocation3], %s1851_s14 }
  0x61   : > { %s455_s22 = scalar_lea.vmem (!%p1706_p3), [#allocation2], %s1854_s26 }
  0x64   : > { %1570 = dma.done.wait (%p1749_p12), %s452_s23, 64  }
  0x65   : > { %1572 = vsyncadd (%p1749_p12), %s452_s23, 4294967232  ;;  %s461_s25 = sand.u32 1, %s1701_s24   ;;  %s465_s28 = scalar_lea.vmem [#allocation5], %s1854_s26 }
  0x66   : > { %s462_s29 = scalar_lea.sflag [#allocation6], %s461_s25 }
  0x67   : > { %1574 = dma.done.wait (%p1749_p12), %s462_s29, 128  }
  0x68   : > { %1576 = vsyncadd (%p1749_p12), %s462_s29, 4294967168  ;;  %s475_s10 = scalar_lea.vmem [#allocation7], %s1854_s26  ;;  %p2012_p3 = scmp.eq.s32.totalorder %s1701_s24, 0 }
  0x6a   : > { %1578 = dma.done.wait (%p2012_p3), [#allocation9], 512   ;;  %p2013_p7 = pmov %p2012_p3 }
  0x6b   : > { %p2014_p9 = pmov %p2012_p3 }
  0x6c   : > { %1580 = vsyncadd (%p2013_p7), [#allocation9], 4294966784 }
  0x6d   : > { %1582 = dma.done.wait (%p2014_p9), [#allocation12], 512   ;;  %p2015_p0 = pmov %p2012_p3 }
  0x6e   : > { %v1183_v0 = vld [vmem:[#allocation8 + $0x8] sm:$0xff]  ;;  %v1185_v1 = vld [vmem:[#allocation10 + $0x8] sm:$0xff]  ;;  %v1182_v2 = vld [vmem:[#allocation8] sm:$0xff]  ;;  %vm569_vm0 = vcmask 261120   ;;  %vm661_vm1 = vcmask 64512   ;;  %s1611_s20 = smov 112  }
  0x6f   : > { %1584 = vsyncadd (%p2015_p0), [#allocation12], 4294966784  ;;  %579 = vmatpush.bf16.msra.mxu0 %v1183_v0  ;;  %616 = vmatpush.bf16.msra.mxu1 %v1185_v1  ;;  %v1184_v3 = vld [vmem:[#allocation10] sm:$0xff]  ;;  %v546_v4 = vld [vmem:[%s455_s22] sm:$0xf]  ;;  %s1612_s1 = smov 120  }
  0x70   : > { %v547_v5 = vld [vmem:[%s465_s28] sm:$0xf]  ;;  %v1295_v6 = vld [vmem:[%s1971_s7] ss:$0 sm:$0xff]  ;;  %s1613_s6 = smov 104   ;;  %v1186_v34 = vld [vmem:[#allocation11] sm:$0xff] }
  0x71   : > { %v1296_v7 = vld [vmem:[%s1972_s8] ss:$0 sm:$0xff]  ;;  %v548_v35 = vld [vmem:[%s475_s10] sm:$0xf]  ;;  %vm696_vm2 = vcmask 1043456   ;;  %s1614_s16 = smov 8  }
  0x72   : > { %v1187_v21 = vld [vmem:[#allocation11 + $0x8] sm:$0xff]  ;;  %s1615_s4 = smov 24   ;;  %s1616_s3 = smov 16   ;;  %vm903_vm3 = vcmask 130048   ;;  %vm905_vm4 = vcmask 195584  }
  0x73   : > { %580 = vmatpush.bf16.msra.mxu0 %v1182_v2  ;;  %617 = vmatpush.bf16.msra.mxu1 %v1184_v3  ;;  %v1297_v50 = vld [vmem:[%s1973_s9] ss:$0 sm:$0xff]  ;;  %s1179_s13 = sshll.u32 %s1701_s24, 3  ;;  %s1133_s26 = sshll.u32 %s1851_s14, 3 }
  0x74   : > { %653 = vmatpush.bf16.msra.mxu2 %v1187_v21  ;;  %s956_s25 = scalar_lea.hbm %s1975_s11, %s1179_s13  ;;  %s2016_s10 = sld [smem:[#allocation30_spill]] }
  0x75   : > { %s544_s27 = scalar_lea.vmem [#allocation14], %s1133_s26  ;;  %s960_s15 = sshll.u32 %s956_s25, 4  ;;  %s961_s15 = int_to_ptr.hbm [resolvable:$true] %s960_s15 }
  0x76   : > { %1142 = vmatmul.msk.bf16.vlgmr.msra.gmra.mxu0 %vm569_vm0, %v546_v4  ;;  %1151 = vmatmul.msk.bf16.vlgmr.msra.gmra.mxu1 %vm569_vm0, %v547_v5  ;;  %s958_s21 = sshll.u32 %s544_s27, 4  ;;  %s946_s24 = scalar_lea.sflag [#allocation4], %s1851_s14  ;;  %s959_s21 = int_to_ptr.vmem [resolvable:$true] %s958_s21 }
  0x77   : > { %s1539_s17 = sshra.s32 %s961_s15, 4  ;;  %s1545_s5 = scalar_lea.hbm %s1975_s11, 16  ;;  %s1540_s17 = int_to_ptr.hbm [resolvable:$true] %s1539_s17 }
  0x78   : > { %654 = vmatpush.bf16.msra.mxu2 %v1186_v34  ;;  %p1546_p8 = scmp.lt.s32.totalorder %s1540_s17, %s1975_s11 }
  0x7b   : > { %1160 = vmatmul.msk.bf16.vlgmr.msra.gmra.mxu2 %vm569_vm0, %v548_v35 }
  0xf3   : > { %v582_v8 = vpop.f32.mrf.mxu0  ;;  %v619_v9 = vpop.f32.mrf.mxu1 }
  0xf4   : > { %v583_v10 = vadd.f32 %v1295_v6, %v582_v8  ;;  %v620_v11 = vadd.f32 %v1296_v7, %v619_v9 }
  0xf6   : > { %v586_v12 = vpack.c.bf16 %v583_v10, %v583_v10  ;;  %v623_v13 = vpack.c.bf16 %v620_v11, %v620_v11 }
  0xf8   : > { %v714_v14 = vunpack.c.l.b16 %v586_v12  ;;  %v719_v15 = vunpack.c.l.b16 %v623_v13  ;;  %v666_v16 = vsel %vm661_vm1, %v623_v13, 0 }
  0xf9   : > { %675 = vmatpush.bf16.xpose.msra.mxu3 %v666_v16 }
  0xfa   : > { %v715_v17 = vpack.c.b16 %v714_v14, %v714_v14  ;;  %v720_v18 = vpack.c.b16 %v719_v15, %v719_v15 }
  0xfb   : > { %v584_v19 = vpop.f32.mrf.mxu0  ;;  %v621_v20 = vpop.f32.mrf.mxu1 }
  0xfc   : > { %780 = vrot.lane.b32.xlu1 %v720_v18, %s1611_s20  ;;  %721 = vrot.lane.b32.xlu0 %v720_v18, %s1612_s1 }
  0xfd   : > { %778 = vrot.lane.b32.xlu2 %v715_v17, %s1611_s20 }
  0xfe   : > { %v656_v51 = vpop.f32.mrf.mxu2 }
  0xff   : > { %v657_v52 = vadd.f32 %v1297_v50, %v656_v51 }
 0x100   : > { %1161 = vmatmul.msk.bf16.vlgmr.msra.gmra.mxu3 %vm661_vm1, %v586_v12 }
 0x101   : > { %v660_v53 = vpack.c.bf16 %v657_v52, %v657_v52 }
 0x103   : > { %v755_v54 = vunpack.c.l.b16 %v660_v53  ;;  %v698_v55 = vsel %vm696_vm2, %v660_v53, 0 }
 0x104   : > { %836 = vrot.lane.b32.xlu1 %v720_v18, %s1613_s6  ;;  %716 = vrot.lane.b32.xlu0 %v715_v17, %s1612_s1 }
 0x105   : > { %834 = vrot.lane.b32.xlu2 %v715_v17, %s1613_s6  ;;  %707 = vmatpush.bf16.msrb.mxu0 %v698_v55  ;;  %v756_v56 = vpack.c.b16 %v755_v54, %v755_v54 }
 0x106   : > { %v658_v57 = vpop.f32.mrf.mxu2 }
 0x157   : > { %v779_v26 = vpop.permute.xlu2 %778 }
 0x15f   : > { %v835_v32 = vpop.permute.xlu2 %834 }
 0x16e   : > { %v781_v22 = vpop.permute.xlu1 %780  ;;  %v722_v23 = vpop.permute.xlu0 %721 }
 0x16f   : > { %v727_v24 = vsel %vm661_vm1, %v722_v23, 0  ;;  %v786_v25 = vsel %vm661_vm1, %v781_v22, 0 }
 0x170   : > { %736 = vmatpush.bf16.xpose.msrb.mxu1 %v727_v24  ;;  %795 = vmatpush.bf16.xpose.msrb.mxu3 %v786_v25 }
 0x176   : > { %v837_v27 = vpop.permute.xlu1 %836  ;;  %v717_v28 = vpop.permute.xlu0 %716 }
 0x177   : > { %v842_v29 = vsel %vm661_vm1, %v837_v27, 0  ;;  %1163 = vmatmul.msk.bf16.vlgmr.msrb.gmra.mxu1 %vm661_vm1, %v717_v28  ;;  %1165 = vmatmul.msk.bf16.vlgmr.msrb.gmra.mxu3 %vm661_vm1, %v779_v26 }
 0x178   : > { %851 = vmatpush.bf16.xpose.msra.mxu1 %v842_v29 }
 0x183   : > { %v677_v30 = vpop.f32.mrf.mxu3 }
 0x184   : > { %v681_v31 = vsel %vm661_vm1, %v677_v30, -inf }
 0x185   : > { %682 = vmax.xlane.f32.xlu1 %v681_v31 }
 0x187   : > { %1167 = vmatmul.msk.bf16.vlgmr.msra.gmra.mxu1 %vm661_vm1, %v835_v32 }
 0x18b   : > { %v679_v33 = vpop.f32.mrf.mxu3 }
 0x1f4   : > { %v738_v36 = vpop.f32.mrf.mxu1 }
 0x1f5   : > { %v742_v37 = vsel %vm661_vm1, %v738_v36, -inf }
 0x1f6   : > { %743 = vmax.xlane.f32.xlu0 %v742_v37 }
 0x1f8   : > { %v683_v38 = vpop.xlane.xlu1 %682 }
 0x1f9   : > { %v684_v39 = vsub.f32 %v677_v30, %v683_v38 }
 0x1fa   : > { %v797_v40 = vpop.f32.mrf.mxu3 }
 0x1fb   : > { %v685_v41 = vmul.f32 1.442695, %v684_v39  ;;  %v801_v49 = vsel %vm661_vm1, %v797_v40, -inf  ;;  %v1189_v39 = vld [vmem:[#allocation13 + $0x8] sm:$0xff] }
 0x1fc   : > { %v740_v42 = vpop.f32.mrf.mxu1  ;;  %937 = vmatpush.bf16.msra.mxu3 %v1189_v39 }
 0x1fd   : > { %1299 = vpow2.f32 %v685_v41 }
 0x202   : > { %v799_v43 = vpop.f32.mrf.mxu3 }
 0x203   : > { %v1300_v44 = vpop.eup %1299 }
 0x204   : > { %v853_v45 = vpop.f32.mrf.mxu1  ;;  %v687_v46 = vsel %vm661_vm1, %v1300_v44, 0.0 }
 0x205   : > { %688 = vadd.xlane.f32.xlu1 %v687_v46  ;;  %v857_v47 = vsel %vm661_vm1, %v853_v45, -inf }
 0x206   : > { %858 = vmax.xlane.f32.xlu2 %v857_v47 }
 0x20c   : > { %v855_v48 = vpop.f32.mrf.mxu1 }
 0x20d   : > { %v1298_v48 = vld [vmem:[%s2016_s10] ss:$0 sm:$0xff] }
 0x20e   : > { %802 = vmax.xlane.f32.xlu2 %v801_v49 }
 0x226   : > { %757 = vrot.lane.b32.xlu2 %v756_v56, %s1612_s1 }
 0x269   : > { %v744_v58 = vpop.xlane.xlu0 %743 }
 0x26a   : > { %v745_v59 = vsub.f32 %v738_v36, %v744_v58 }
 0x26c   : > { %v746_v60 = vmul.f32 1.442695, %v745_v59 }
 0x26e   : > { %1301 = vpow2.f32 %v746_v60 }
 0x274   : > { %v1302_v61 = vpop.eup %1301 }
 0x275   : > { %v748_v62 = vsel %vm661_vm1, %v1302_v61, 0.0 }
 0x276   : > { %749 = vadd.xlane.f32.xlu0 %v748_v62 }
 0x278   : > { %v689_v63 = vpop.xlane.xlu1 %688 }
 0x279   : > { %1303 = vrcp.f32 %v689_v63  ;;  %v859_v0 = vpop.xlane.xlu2 %858 }
 0x27a   : > { %v860_v1 = vsub.f32 %v853_v45, %v859_v0 }
 0x27c   : > { %v861_v2 = vmul.f32 1.442695, %v860_v1 }
 0x27e   : > { %1305 = vpow2.f32 %v861_v2 }
 0x27f   : > { %v1304_v3 = vpop.eup %1303 }
 0x280   : > { %v691_v4 = vmul.f32 %v1304_v3, %v1300_v44 }
 0x281   : > { %v803_v5 = vpop.xlane.xlu2 %802 }
 0x282   : > { %v804_v6 = vsub.f32 %v797_v40, %v803_v5  ;;  %v692_v7 = vpack.c.bf16 %v691_v4, %v691_v4  ;;  %v1188_v40 = vld [vmem:[#allocation13] sm:$0xff] }
 0x283   : > { %938 = vmatpush.bf16.msra.mxu3 %v1188_v40 }
 0x284   : > { %v1306_v8 = vpop.eup %1305  ;;  %v805_v9 = vmul.f32 1.442695, %v804_v6  ;;  %1162 = vmatmul.msk.bf16.vlgmr.msrb.gmra.mxu0 %vm661_vm1, %v692_v7 }
 0x285   : > { %v863_v10 = vsel %vm661_vm1, %v1306_v8, 0.0 }
 0x286   : > { %1307 = vpow2.f32 %v805_v9  ;;  %864 = vadd.xlane.f32.xlu0 %v863_v10 }
 0x289   : > { %v758_v13 = vpop.permute.xlu2 %757 }
 0x28a   : > { %v763_v14 = vsel %vm696_vm2, %v758_v13, 0 }
 0x28b   : > { %772 = vmatpush.bf16.msrb.mxu2 %v763_v14 }
 0x28c   : > { %v1308_v11 = vpop.eup %1307 }
 0x28d   : > { %v807_v12 = vsel %vm661_vm1, %v1308_v11, 0.0 }
 0x28e   : > { %808 = vadd.xlane.f32.xlu1 %v807_v12 }
 0x29a   : > { %869 = vrot.lane.b32.xlu0 %v756_v56, %s1613_s6 }
 0x2a7   : > { %813 = vrot.lane.b32.xlu1 %v756_v56, %s1611_s20  ;;  %s1541_s20 = scalar_lea.hbm %s1540_s17, 8 }
 0x2a8   : > { %p1542_p12 = scmp.ne.s32.totalorder %s1540_s17, %s1541_s20  ;;  %p1547_p10 = scmp.lt.s32.totalorder %s1545_s5, %s1541_s20 }
 0x2aa   : > { %p1543_p2 = pnand %p1542_p12, %p1756_p4  ;;  %p1548_p6 = por %p1547_p10, %p1546_p8 }
 0x2ac   : > { %p1544_p1 = pneg %p1543_p2 }
 0x2ae   : > { %p1549_p11 = pnand %p1548_p6, %p1544_p1 }
 0x2e9   : > { %v750_v15 = vpop.xlane.xlu0 %749 }
 0x2ea   : > { %1309 = vrcp.f32 %v750_v15 }
 0x2f0   : > { %v1310_v16 = vpop.eup %1309 }
 0x2f1   : > { %v752_v17 = vmul.f32 %v1310_v16, %v1302_v61 }
 0x2f3   : > { %v753_v18 = vpack.c.bf16 %v752_v17, %v752_v17 }
 0x2f5   : > { %1164 = vmatmul.msk.bf16.vlgmr.msrb.gmra.mxu2 %vm661_vm1, %v753_v18 }
 0x2f9   : > { %v865_v19 = vpop.xlane.xlu0 %864 }
 0x2fa   : > { %1311 = vrcp.f32 %v865_v19 }
 0x300   : > { %v1312_v21 = vpop.eup %1311 }
 0x301   : > { %v709_v20 = vpop.f32.mrf.mxu0  ;;  %v867_v23 = vmul.f32 %v1312_v21, %v1306_v8  ;;  %v809_v24 = vpop.xlane.xlu1 %808 }
 0x302   : > { %1313 = vrcp.f32 %v809_v24 }
 0x303   : > { %v868_v27 = vpack.c.bf16 %v867_v23, %v867_v23 }
 0x308   : > { %v1314_v28 = vpop.eup %1313 }
 0x309   : > { %v711_v22 = vpop.f32.mrf.mxu0  ;;  %v811_v29 = vmul.f32 %v1314_v28, %v1308_v11 }
 0x30b   : > { %v812_v32 = vpack.c.bf16 %v811_v29, %v811_v29 }
 0x30c   : > { %v870_v25 = vpop.permute.xlu0 %869 }
 0x30d   : > { %v875_v26 = vsel %vm696_vm2, %v870_v25, 0 }
 0x30e   : > { %884 = vmatpush.bf16.msra.mxu2 %v875_v26 }
 0x311   : > { %1168 = vmatmul.msk.bf16.vlgmr.msra.gmra.mxu2 %vm661_vm1, %v868_v27 }
 0x319   : > { %v814_v30 = vpop.permute.xlu1 %813 }
 0x31a   : > { %v819_v31 = vsel %vm696_vm2, %v814_v30, 0 }
 0x31b   : > { %828 = vmatpush.bf16.msra.mxu0 %v819_v31 }
 0x31e   : > { %1166 = vmatmul.msk.bf16.vlgmr.msra.gmra.mxu0 %vm661_vm1, %v812_v32 }
 0x378   : > { %v774_v33 = vpop.f32.mrf.mxu2 }
 0x379   : > { %891 = vrot.lane.b32.xlu2 %v774_v33, %s1614_s16 }
 0x380   : > { %v776_v34 = vpop.f32.mrf.mxu2 }
 0x394   : > { %v886_v35 = vpop.f32.mrf.mxu2 }
 0x395   : > { %899 = vrot.lane.b32.xlu2 %v886_v35, %s1615_s4 }
 0x39b   : > { %v830_v36 = vpop.f32.mrf.mxu0 }
 0x39c   : > { %895 = vrot.lane.b32.xlu0 %v830_v36, %s1616_s3  ;;  %v888_v37 = vpop.f32.mrf.mxu2 }
 0x3a3   : > { %v832_v38 = vpop.f32.mrf.mxu0 }
 0x3d3   : > { %v892_v41 = vpop.permute.xlu2 %891 }
 0x3d4   : > { %v902_v42 = vsel %vm661_vm1, %v709_v20, %v892_v41 }
 0x3ef   : > { %v900_v44 = vpop.permute.xlu2 %899 }
 0x40e   : > { %v896_v43 = vpop.permute.xlu0 %895 }
 0x40f   : > { %v904_v45 = vsel %vm903_vm3, %v902_v42, %v896_v43 }
 0x410   : > { %v906_v46 = vsel %vm905_vm4, %v904_v45, %v900_v44 }
 0x411   : > { %v907_v47 = vpack.c.bf16 %v906_v46, %v906_v46 }
 0x413   : > { %1177 = vmatmul.msk.bf16.vlgmr.msra.gmra.mxu3 %vm569_vm0, %v907_v47 }
 0x496   : > { %v940_v49 = vpop.f32.mrf.mxu3 }
 0x497   : > { %v941_v50 = vadd.f32 %v1298_v48, %v940_v49 }
 0x499   : > { %944 = vst.msk [vmem:[%s544_s27] sm:$0xff] %vm569_vm0, %v941_v50 }
 0x49a   : > { %1552 = shalt.err (!%p1549_p11)
}
 0x49b   : > { %1212 = dma.vmem_to_hbm [thread:$0]  (%p1756_p4), %s959_s21, 128, %s961_s15, %s946_s24  }
 0x49e   : > { %v942_v51 = vpop.f32.mrf.mxu3 }
 0x49f PF: > { %s2017_s14 = sld [smem:[#allocation20_spill]] }
 0x4a0   : > { %s2019_s3 = sld [smem:[#allocation21_spill]] }
 0x4a5   : > { %s972_s13 = sand.u32 1, %s2017_s14  }
 0x4a6   : > { %p2020_p13 = scmp.ge.s32.totalorder %s2019_s3, 2  ;;  %s973_s26 = scalar_lea.sflag [#allocation4], %s972_s13 }
 0x4a8   : > { %p1238_p3 = pnand %p2020_p13, %p1760_p5 }
 0x4aa   : > { %p1239_p7 = pneg %p1238_p3 }
 0x4ac   : > { %1586 = dma.done.wait (%p1239_p7), %s973_s26, 128  }
 0x4ad   : > { %1588 = vsyncadd (%p1239_p7), %s973_s26, 4294967168  ;;  %s2021_s20 = sld [smem:[#allocation22_spill]]  ;;  %s2023_s17 = smov %s1595_s18 }
 0x4ae   : > { %s2022_s23 = sld [smem:[#allocation23_spill]]  ;;  %s2024_s18 = smov %s1599_s19 }
 0x4b3   : > { %p29_p9 = scmp.ge.s32.totalorder %s2021_s20, 4  }
 0x4b4   : > { %s2025_s19 = smov %s2022_s23 }
 0x4b5   :  { %31 = sbr.rel (!%p29_p9) target bundleno = 16 (0x10), region = 149 }
 0x4ba   :  { %979 = vsyncpa [#allocation3], 1 }
 0x4bb   :  { %981 = vsyncpa [#allocation3 + $0x1], 1 }
 0x4bc   :  { %982 = vsyncpa [#allocation6], 1 }
 0x4bd   :  { %984 = vsyncpa [#allocation6 + $0x1], 1 }
 0x4be   :  { %985 = vsyncpa [#allocation9], 1 }
 0x4bf   :  { %986 = vsyncpa [#allocation12], 1 }
 0x4c0   :  { %987 = vsyncpa [#allocation4], 1 }
 0x4c1   :  { %989 = vsyncpa [#allocation4 + $0x1], 1 }

</bundles_post_ra>
